<compile_context>
chip_gen: v5e
topology: v5e:2x2
jax: 0.10.0
libtpu: 0.0.40
codegen_flags: <defaults>
</compile_context>

<pallas_src>
import math
from functools import partial

import jax
import jax.numpy as jnp
from jax.experimental import pallas as pl
from jax.experimental.pallas import tpu as pltpu

ACT_DTYPE = jnp.bfloat16          # inter-kernel activation dtype (halves HBM traffic)
MXU_DTYPE = jnp.bfloat16          # matmul operand dtype


def _detect_kind():
    try:
        return jax.devices()[0].device_kind.lower()
    except Exception:
        return ""


_KIND = _detect_kind()
# v5e / v6e have 128 MiB VMEM per TensorCore; v7x has 64 MiB -> stay at 48 MiB there.
_HAS_128MB_VMEM = any(t in _KIND for t in ("v5 lite", "v5e", "v5litepod", "v6", "trillium"))
VMEM_LIMIT_BYTES = (100 if _HAS_128MB_VMEM else 48) * 1024 * 1024
# bf16 element-wise (VALU/EUP) is native on v6e/v7x; emulated (slow) on v5e and older.
_BF16_ELEMENTWISE = not any(t in _KIND for t in ("v2", "v3", "v4", "v5"))


def _tile(dim, pref, align=128):
    """Largest tile <= pref that divides `dim` and is a multiple of `align`.

    Falls back through smaller aligned divisors (pref -> pref/2 -> ...) instead of
    silently returning one giant full-dim block.
    """
    if dim <= pref:
        return dim
    t = pref
    while t >= align:
        if dim % t == 0:
            return t
        t //= 2
    # TODO(synk): pad + mask edge tiles for dims with no aligned divisor.
    return dim


# ----------------------------- Pallas kernels -----------------------------

def _matmul_kernel(x_ref, w_ref, b_ref, o_ref, acc_ref, *, activation):
    """Tiled y = x @ w + b (grid: rows, out-cols, reduction-last)."""
    @pl.when(pl.program_id(2) == 0)
    def _():
        acc_ref[...] = jnp.zeros_like(acc_ref)

    acc_ref[...] += jnp.dot(x_ref[...], w_ref[...],
                            preferred_element_type=jnp.float32)

    @pl.when(pl.program_id(2) == pl.num_programs(2) - 1)
    def _():
        y = acc_ref[...] + b_ref[...].astype(jnp.float32)
        if activation == "gelu":
            # TODO(synk): HF BERT uses exact erf-GELU; tanh approximation used here.
            y = jax.nn.gelu(y, approximate=True)
        o_ref[...] = y.astype(o_ref.dtype)


def fused_linear(x, w, b, activation="none", out_dtype=None):
    """x: [N, Din] @ w: [Din, Dout] + b: [Dout]."""
    n, din = x.shape
    dout = w.shape[1]
    out_dtype = x.dtype if out_dtype is None else out_dtype
    tm = _tile(n, 512, align=8)
    tn = _tile(dout, 256)
    tk = _tile(din, 512)
    grid = (n // tm, dout // tn, din // tk)
    return pl.pallas_call(
        partial(_matmul_kernel, activation=activation),
        out_shape=jax.ShapeDtypeStruct((n, dout), out_dtype),
        grid=grid,
        in_specs=[pl.BlockSpec((tm, tk), lambda i, j, k: (i, k)),
                  pl.BlockSpec((tk, tn), lambda i, j, k: (k, j)),
                  pl.BlockSpec((1, tn), lambda i, j, k: (0, j))],
        out_specs=pl.BlockSpec((tm, tn), lambda i, j, k: (i, j)),
        scratch_shapes=[pltpu.VMEM((tm, tn), jnp.float32)],
        compiler_params=pltpu.CompilerParams(
            dimension_semantics=("parallel", "parallel", "arbitrary"),
            vmem_limit_bytes=VMEM_LIMIT_BYTES),
    )(x, w, b.reshape(1, dout))


def _linear_res_ln_kernel(x_ref, w_ref, b_ref, r_ref, g_ref, beta_ref,
                          o_ref, acc_ref, *, eps):
    """out = LayerNorm(x @ w + b + residual); grid: (row tiles, K tiles)."""
    @pl.when(pl.program_id(1) == 0)
    def _():
        acc_ref[...] = jnp.zeros_like(acc_ref)

    acc_ref[...] += jnp.dot(x_ref[...], w_ref[...],
                            preferred_element_type=jnp.float32)

    @pl.when(pl.program_id(1) == pl.num_programs(1) - 1)
    def _():
        y = acc_ref[...] + b_ref[...].astype(jnp.float32) + r_ref[...].astype(jnp.float32)
        mu = jnp.mean(y, axis=-1, keepdims=True)
        yc = y - mu
        var = jnp.mean(yc * yc, axis=-1, keepdims=True)
        out = yc * jax.lax.rsqrt(var + eps)
        o_ref[...] = (out * g_ref[...].astype(jnp.float32)
                      + beta_ref[...].astype(jnp.float32)).astype(o_ref.dtype)


def linear_residual_layernorm(x, w, b, residual, gamma, beta, eps=1e-12):
    n, din = x.shape
    dout = w.shape[1]
    tm = _tile(n, 512, align=8)
    tk = _tile(din, 512)
    grid = (n // tm, din // tk)
    return pl.pallas_call(
        partial(_linear_res_ln_kernel, eps=eps),
        out_shape=jax.ShapeDtypeStruct((n, dout), x.dtype),
        grid=grid,
        in_specs=[pl.BlockSpec((tm, tk), lambda i, k: (i, k)),
                  pl.BlockSpec((tk, dout), lambda i, k: (k, 0)),
                  pl.BlockSpec((1, dout), lambda i, k: (0, 0)),
                  pl.BlockSpec((tm, dout), lambda i, k: (i, 0)),
                  pl.BlockSpec((1, dout), lambda i, k: (0, 0)),
                  pl.BlockSpec((1, dout), lambda i, k: (0, 0))],
        out_specs=pl.BlockSpec((tm, dout), lambda i, k: (i, 0)),
        scratch_shapes=[pltpu.VMEM((tm, dout), jnp.float32)],
        compiler_params=pltpu.CompilerParams(
            dimension_semantics=("parallel", "arbitrary"),
            vmem_limit_bytes=VMEM_LIMIT_BYTES),
    )(x, w, b.reshape(1, dout), residual, gamma.reshape(1, dout), beta.reshape(1, dout))


def _ffn_kernel(x_ref, w1_ref, b1_ref, w2_ref, b2_ref, g_ref, beta_ref,
                o_ref, acc_ref, *, eps, bf16_elementwise):
    """Fused FFN: LayerNorm(GELU(x@w1+b1)@w2 + b2 + x).

    Grid: (row tiles, intermediate-dim tiles); the [N, I] intermediate activation
    lives only in VMEM/vregs for the current tile and never touches HBM.
    x doubles as the residual (same block across the reduction axis) — no separate
    residual stream is read from HBM.
    """
    @pl.when(pl.program_id(1) == 0)
    def _():
        acc_ref[...] = jnp.zeros_like(acc_ref)

    mid = jnp.dot(x_ref[...], w1_ref[...], preferred_element_type=jnp.float32)
    # TODO(synk): HF BERT uses exact erf-GELU; tanh approximation used here.
    if bf16_elementwise:
        mid = mid.astype(jnp.bfloat16) + b1_ref[...].astype(jnp.bfloat16)
        mid = jax.nn.gelu(mid, approximate=True)
    else:
        mid = mid + b1_ref[...].astype(jnp.float32)
        mid = jax.nn.gelu(mid, approximate=True)
    acc_ref[...] += jnp.dot(mid.astype(w2_ref.dtype), w2_ref[...],
                            preferred_element_type=jnp.float32)

    @pl.when(pl.program_id(1) == pl.num_programs(1) - 1)
    def _():
        y = acc_ref[...] + b2_ref[...].astype(jnp.float32) + x_ref[...].astype(jnp.float32)
        mu = jnp.mean(y, axis=-1, keepdims=True)
        yc = y - mu
        var = jnp.mean(yc * yc, axis=-1, keepdims=True)
        out = yc * jax.lax.rsqrt(var + eps)
        o_ref[...] = (out * g_ref[...].astype(jnp.float32)
                      + beta_ref[...].astype(jnp.float32)).astype(o_ref.dtype)


def fused_ffn(x, w1, b1, w2, b2, gamma, beta, eps=1e-12):
    """LayerNorm(GELU(x@w1+b1)@w2 + b2 + x); x is also the residual."""
    n, h = x.shape
    inter = w1.shape[1]
    tm = _tile(n, 512, align=8)
    ti = _tile(inter, 512)
    grid = (n // tm, inter // ti)
    return pl.pallas_call(
        partial(_ffn_kernel, eps=eps, bf16_elementwise=_BF16_ELEMENTWISE),
        out_shape=jax.ShapeDtypeStruct((n, h), x.dtype),
        grid=grid,
        in_specs=[pl.BlockSpec((tm, h), lambda i, j: (i, 0)),
                  pl.BlockSpec((h, ti), lambda i, j: (0, j)),
                  pl.BlockSpec((1, ti), lambda i, j: (0, j)),
                  pl.BlockSpec((ti, h), lambda i, j: (j, 0)),
                  pl.BlockSpec((1, h), lambda i, j: (0, 0)),
                  pl.BlockSpec((1, h), lambda i, j: (0, 0)),
                  pl.BlockSpec((1, h), lambda i, j: (0, 0))],
        out_specs=pl.BlockSpec((tm, h), lambda i, j: (i, 0)),
        scratch_shapes=[pltpu.VMEM((tm, h), jnp.float32)],
        compiler_params=pltpu.CompilerParams(
            dimension_semantics=("parallel", "arbitrary"),
            vmem_limit_bytes=VMEM_LIMIT_BYTES),
    )(x, w1, b1.reshape(1, inter), w2, b2.reshape(1, h),
      gamma.reshape(1, h), beta.reshape(1, h))


def _layernorm_kernel(x_ref, g_ref, b_ref, o_ref, *, eps):
    """Residual-free LayerNorm (embedding LN) — no zeros tensor DMA."""
    x = x_ref[...].astype(jnp.float32)
    mu = jnp.mean(x, axis=-1, keepdims=True)
    xc = x - mu
    var = jnp.mean(xc * xc, axis=-1, keepdims=True)
    y = xc * jax.lax.rsqrt(var + eps)
    o_ref[...] = (y * g_ref[...].astype(jnp.float32)
                  + b_ref[...].astype(jnp.float32)).astype(o_ref.dtype)


def layernorm(x, gamma, beta, eps=1e-12, out_dtype=None):
    n, h = x.shape
    out_dtype = x.dtype if out_dtype is None else out_dtype
    tm = _tile(n, 512, align=8)
    grid = (n // tm,)
    return pl.pallas_call(
        partial(_layernorm_kernel, eps=eps),
        out_shape=jax.ShapeDtypeStruct((n, h), out_dtype),
        grid=grid,
        in_specs=[pl.BlockSpec((tm, h), lambda i: (i, 0)),
                  pl.BlockSpec((1, h), lambda i: (0, 0)),
                  pl.BlockSpec((1, h), lambda i: (0, 0))],
        out_specs=pl.BlockSpec((tm, h), lambda i: (i, 0)),
        compiler_params=pltpu.CompilerParams(
            dimension_semantics=("parallel",),
            vmem_limit_bytes=VMEM_LIMIT_BYTES),
    )(x, gamma.reshape(1, h), beta.reshape(1, h))


def _attention_kernel(qkv_ref, bias_ref, o_ref, *, num_heads, scale, tq):
    """Attention on lane-dense [S, 3H] QKV for one batch element / one query tile.

    Softmax statistics in f32; MXU operands in bf16.  Each head's [tq, dh] context
    is written straight into the output tile (no per-head list + concat, which
    would keep num_heads [S, dh] f32 tensors live and spill the 64-vreg file).
    """
    s_len, three_h = qkv_ref.shape
    hidden = three_h // 3
    dh = hidden // num_heads
    q0 = pl.multiple_of(pl.program_id(1) * tq, tq)
    bias = bias_ref[...].astype(jnp.float32)            # [1, S] additive mask bias

    # TODO(synk): at BERT-base dims process heads in pairs (2*64 = 128 lanes) via a
    # batched dot_general, and switch to flash-style online-softmax KV tiling for
    # long sequences (mandatory within v7x's 64 MiB VMEM).
    for hh in range(num_heads):
        q = qkv_ref[pl.ds(q0, tq), pl.ds(hh * dh, dh)]                 # [tq, dh]
        k = qkv_ref[:, pl.ds(hidden + hh * dh, dh)]                    # [S, dh]
        v = qkv_ref[:, pl.ds(2 * hidden + hh * dh, dh)]                # [S, dh]
        # Contract last dims directly — no explicit k.T transpose.
        s = jax.lax.dot_general(q, k, (((1,), (1,)), ((), ())),
                                preferred_element_type=jnp.float32)    # [tq, S]
        s = s * scale + bias
        m = jnp.max(s, axis=-1, keepdims=True)
        p = jnp.exp(s - m)
        inv = pl.reciprocal(jnp.sum(p, axis=-1, keepdims=True), approx=True)
        p = (p * inv).astype(v.dtype)
        ctx = jnp.dot(p, v, preferred_element_type=jnp.float32)        # [tq, dh]
        o_ref[:, pl.ds(hh * dh, dh)] = ctx.astype(o_ref.dtype)


def attention(qkv, bias, *, num_heads):
    """qkv: [B, S, 3H] (fused QKV projection output); bias: [B, 1, S] additive mask.

    Returns head-merged context [B, S, H].  Grid = (batch, query tiles) — two
    parallel axes so v7x's 2 TensorCores stay busy even at B == 1.
    """
    b, s, three_h = qkv.shape
    hidden = three_h // 3
    dh = hidden // num_heads
    scale = 1.0 / math.sqrt(dh)
    tq = _tile(s, 256, align=8)
    grid = (b, s // tq)
    return pl.pallas_call(
        partial(_attention_kernel, num_heads=num_heads, scale=scale, tq=tq),
        out_shape=jax.ShapeDtypeStruct((b, s, hidden), qkv.dtype),
        grid=grid,
        in_specs=[pl.BlockSpec((pl.Squeezed(), s, three_h), lambda i, j: (i, 0, 0)),
                  pl.BlockSpec((pl.Squeezed(), 1, s), lambda i, j: (i, 0, 0))],
        out_specs=pl.BlockSpec((pl.Squeezed(), tq, hidden), lambda i, j: (i, j, 0)),
        compiler_params=pltpu.CompilerParams(
            dimension_semantics=("parallel", "parallel"),
            vmem_limit_bytes=VMEM_LIMIT_BYTES),
    )(qkv, bias)


# ----------------------------- model (glue in JAX) -----------------------------

def init_params(key, cfg):
    H, I, L = cfg["hidden"], cfg["intermediate"], cfg["labels"]

    def nrm(k, shape):
        return (0.02 * jax.random.normal(k, shape)).astype(jnp.float32)

    keys = iter(jax.random.split(key, 8 + cfg["layers"] * 8))
    params = dict(
        word_emb=nrm(next(keys), (cfg["vocab"], H)),
        pos_emb=nrm(next(keys), (cfg["max_pos"], H)),
        type_emb=nrm(next(keys), (cfg["type_vocab"], H)),
        emb_ln_g=jnp.ones((H,), jnp.float32),
        emb_ln_b=jnp.zeros((H,), jnp.float32),
        fc_w=nrm(next(keys), (H, L)),
        fc_b=jnp.zeros((L,), jnp.float32),
        layers=[],
    )
    for _ in range(cfg["layers"]):
        params["layers"].append(dict(
            wq=nrm(next(keys), (H, H)), bq=jnp.zeros((H,), jnp.float32),
            wk=nrm(next(keys), (H, H)), bk=jnp.zeros((H,), jnp.float32),
            wv=nrm(next(keys), (H, H)), bv=jnp.zeros((H,), jnp.float32),
            wo=nrm(next(keys), (H, H)), bo=jnp.zeros((H,), jnp.float32),
            ln1_g=jnp.ones((H,), jnp.float32), ln1_b=jnp.zeros((H,), jnp.float32),
            w1=nrm(next(keys), (H, I)), b1=jnp.zeros((I,), jnp.float32),
            w2=nrm(next(keys), (I, H)), b2=jnp.zeros((H,), jnp.float32),
            ln2_g=jnp.ones((H,), jnp.float32), ln2_b=jnp.zeros((H,), jnp.float32),
        ))
    return params


def pack_params(params, dtype=MXU_DTYPE):
    """Cast matmul weights to bf16 and pre-concatenate Q/K/V into one [H, 3H] weight."""
    packed = dict(
        word_emb=params["word_emb"], pos_emb=params["pos_emb"],
        type_emb=params["type_emb"],
        emb_ln_g=params["emb_ln_g"], emb_ln_b=params["emb_ln_b"],
        fc_w=params["fc_w"], fc_b=params["fc_b"],   # tiny head stays f32 / XLA
        layers=[],
    )
    for L in params["layers"]:
        packed["layers"].append(dict(
            w_qkv=jnp.concatenate([L["wq"], L["wk"], L["wv"]], axis=1).astype(dtype),
            b_qkv=jnp.concatenate([L["bq"], L["bk"], L["bv"]], axis=0),
            wo=L["wo"].astype(dtype), bo=L["bo"],
            ln1_g=L["ln1_g"], ln1_b=L["ln1_b"],
            w1=L["w1"].astype(dtype), b1=L["b1"],
            w2=L["w2"].astype(dtype), b2=L["b2"],
            ln2_g=L["ln2_g"], ln2_b=L["ln2_b"],
        ))
    return packed


def bert_classification_forward(params, x, cfg):
    """x is a dict: {'input_ids', 'attention_mask', 'token_type_ids'} each [B, S]."""
    input_ids = x["input_ids"]
    attention_mask = x["attention_mask"]
    token_type_ids = x["token_type_ids"]

    B, S = input_ids.shape
    H, nH = cfg["hidden"], cfg["heads"]

    # Embedding gather (parameter-lookup glue in XLA), cast to bf16 before the
    # Pallas LayerNorm so the only f32 activation stream disappears.
    emb = (params["word_emb"][input_ids]
           + params["pos_emb"][None, :S, :]
           + params["type_emb"][token_type_ids]).astype(ACT_DTYPE)   # [B, S, H] bf16
    h = layernorm(emb.reshape(B * S, H), params["emb_ln_g"], params["emb_ln_b"],
                  out_dtype=ACT_DTYPE)                               # [B*S, H] bf16

    # Additive attention-mask bias per batch: [B, 1, S], f32.
    mask_bias = ((1.0 - attention_mask.astype(jnp.float32)) * -1e9)[:, None, :]

    for layer in params["layers"]:
        # Fused Q/K/V projection: one matmul against the packed [H, 3H] weight.
        qkv = fused_linear(h, layer["w_qkv"], layer["b_qkv"])        # [B*S, 3H]
        # Attention per (batch, query-tile) on lane-dense [S, 3H] blocks.
        ctx = attention(qkv.reshape(B, S, 3 * H), mask_bias, num_heads=nH)
        # Attention output projection + residual + LayerNorm, fused.
        h = linear_residual_layernorm(ctx.reshape(B * S, H), layer["wo"], layer["bo"],
                                      h, layer["ln1_g"], layer["ln1_b"])
        # FFN (w1 + GELU + w2) + residual + LayerNorm, fused; [N, I] never hits HBM.
        h = fused_ffn(h, layer["w1"], layer["b1"], layer["w2"], layer["b2"],
                      layer["ln2_g"], layer["ln2_b"])

    # last_hidden_state[:, 0, :] -> fc head. Tiny [B,H]@[H,labels] stays in XLA: a
    # pallas_call with labels<128 output lanes is pure fixed overhead + masked vst.
    cls_h = h.reshape(B, S, H)[:, 0, :].astype(jnp.float32)          # [B, H]
    pred = jnp.dot(cls_h, params["fc_w"],
                   preferred_element_type=jnp.float32) + params["fc_b"]
    return pred


# ----------------------------- main -----------------------------

if __name__ == "__main__":
    # Small demo config; tiling/pipelining choices are meant to be benchmarked at
    # real BERT dims (H>=768, S>=128) where the tiles are actually exercised.
    cfg = dict(vocab=100, hidden=32, heads=2, layers=2, intermediate=64,
               max_pos=16, type_vocab=2, labels=4)

    key = jax.random.PRNGKey(0)
    pkey, ikey = jax.random.split(key)
    params = pack_params(init_params(pkey, cfg))

    B, S = 2, 8
    x = {
        "input_ids": jax.random.randint(ikey, (B, S), 0, cfg["vocab"], dtype=jnp.int32),
        "attention_mask": jnp.ones((B, S), dtype=jnp.int32),
        "token_type_ids": jnp.zeros((B, S), dtype=jnp.int32),
    }

    pred = bert_classification_forward(params, x, cfg)
    jax.block_until_ready(pred)
    assert pred.shape == (B, cfg["labels"])
    print("KERNEL_OK")
</pallas_src>

<mosaic_0001>
module attributes {stable_mosaic.version = 11 : i64} {
  func.func @_layernorm_kernel(%arg0: i32, %arg1: memref<16x32xbf16, #tpu.memory_space<vmem>>, %arg2: memref<1x32xf32, #tpu.memory_space<vmem>>, %arg3: memref<1x32xf32, #tpu.memory_space<vmem>>, %arg4: memref<16x32xbf16, #tpu.memory_space<vmem>>) attributes {dimension_semantics = [#tpu.dimension_semantics<parallel>], iteration_bounds = array<i64: 1>, scalar_prefetch = 0 : i64, scratch_operands = 0 : i64, tpu.core_type = #tpu.core_type<tc>, window_params = [{transform_indices = @transform_0, window_bounds = array<i64: 16, 32>}, {pipeline_mode = #tpu.pipeline_mode<synchronous>, transform_indices = @transform_1, window_bounds = array<i64: 1, 32>}, {pipeline_mode = #tpu.pipeline_mode<synchronous>, transform_indices = @transform_2, window_bounds = array<i64: 1, 32>}, {transform_indices = @transform_3, window_bounds = array<i64: 16, 32>}]} {
    %c0 = arith.constant 0 : index
    %c0_0 = arith.constant 0 : index
    %0 = vector.load %arg1[%c0, %c0_0] : memref<16x32xbf16, #tpu.memory_space<vmem>>, vector<16x32xbf16>
    %1 = arith.extf %0 : vector<16x32xbf16> to vector<16x32xf32>
    %cst = arith.constant dense<0.000000e+00> : vector<16xf32>
    %2 = vector.multi_reduction <add>, %1, %cst [1] : vector<16x32xf32> to vector<16xf32>
    %3 = vector.shape_cast %2 : vector<16xf32> to vector<16x1xf32>
    %cst_1 = arith.constant 3.200000e+01 : f32
    %4 = vector.broadcast %cst_1 : f32 to vector<16x1xf32>
    %5 = arith.divf %3, %4 : vector<16x1xf32>
    %6 = vector.broadcast %5 : vector<16x1xf32> to vector<16x32xf32>
    %7 = arith.subf %1, %6 : vector<16x32xf32>
    %8 = arith.mulf %7, %7 : vector<16x32xf32>
    %cst_2 = arith.constant dense<0.000000e+00> : vector<16xf32>
    %9 = vector.multi_reduction <add>, %8, %cst_2 [1] : vector<16x32xf32> to vector<16xf32>
    %10 = vector.shape_cast %9 : vector<16xf32> to vector<16x1xf32>
    %cst_3 = arith.constant 3.200000e+01 : f32
    %11 = vector.broadcast %cst_3 : f32 to vector<16x1xf32>
    %12 = arith.divf %10, %11 : vector<16x1xf32>
    %cst_4 = arith.constant 9.99999996E-13 : f32
    %13 = vector.broadcast %cst_4 : f32 to vector<16x1xf32>
    %14 = arith.addf %12, %13 : vector<16x1xf32>
    %15 = math.rsqrt %14 : vector<16x1xf32>
    %16 = vector.broadcast %15 : vector<16x1xf32> to vector<16x32xf32>
    %17 = arith.mulf %7, %16 : vector<16x32xf32>
    %c0_5 = arith.constant 0 : index
    %c0_6 = arith.constant 0 : index
    %18 = vector.load %arg2[%c0_5, %c0_6] : memref<1x32xf32, #tpu.memory_space<vmem>>, vector<1x32xf32>
    %19 = vector.broadcast %18 : vector<1x32xf32> to vector<16x32xf32>
    %20 = arith.mulf %17, %19 : vector<16x32xf32>
    %c0_7 = arith.constant 0 : index
    %c0_8 = arith.constant 0 : index
    %21 = vector.load %arg3[%c0_7, %c0_8] : memref<1x32xf32, #tpu.memory_space<vmem>>, vector<1x32xf32>
    %22 = vector.broadcast %21 : vector<1x32xf32> to vector<16x32xf32>
    %23 = arith.addf %20, %22 : vector<16x32xf32>
    %24 = arith.truncf %23 : vector<16x32xf32> to vector<16x32xbf16>
    %c0_9 = arith.constant 0 : index
    %c0_10 = arith.constant 0 : index
    %25 = vector.load %arg4[%c0_9, %c0_10] : memref<16x32xbf16, #tpu.memory_space<vmem>>, vector<16x32xbf16>
    tpu.vector_store %arg4[%c0_9, %c0_10], %24 {strides = array<i32>} : memref<16x32xbf16, #tpu.memory_space<vmem>>, vector<16x32xbf16>,
    return
  }
  func.func @transform_0(%arg0: i32) -> (i32, i32) {
    %c0_i32 = arith.constant 0 : i32
    %c0_i32_0 = arith.constant 0 : i32
    return %arg0, %c0_i32 : i32, i32
  }
  func.func @transform_1(%arg0: i32) -> (i32, i32) {
    %c0_i32 = arith.constant 0 : i32
    %c0_i32_0 = arith.constant 0 : i32
    %c0_i32_1 = arith.constant 0 : i32
    return %c0_i32, %c0_i32_0 : i32, i32
  }
  func.func @transform_2(%arg0: i32) -> (i32, i32) {
    %c0_i32 = arith.constant 0 : i32
    %c0_i32_0 = arith.constant 0 : i32
    %c0_i32_1 = arith.constant 0 : i32
    return %c0_i32, %c0_i32_0 : i32, i32
  }
  func.func @transform_3(%arg0: i32) -> (i32, i32) {
    %c0_i32 = arith.constant 0 : i32
    %c0_i32_0 = arith.constant 0 : i32
    return %arg0, %c0_i32 : i32, i32
  }
}

</mosaic_0001>

<bundles_post_ra>
// kernel: tpu_custom_call.1
= control target key start
LH: loop header
LB: loop body
LE: loop exit
PB: predicated region body
PF: predicated region fallthrough
CT: control target
= control target key end

     0   :  { %8 = vsyncpa [#allocation3], 0  ;;  %s282_s0 = inlined_call_operand.hbm [shape: bf16[16,32], index: 0, kind: input, shape index: {}]   ;;  %s283_s1 = inlined_call_operand.hbm [shape: f32[1,32], index: 1, kind: input, shape index: {}]   ;;  %s284_s2 = inlined_call_operand.vmem [shape: f32[1,32], index: 2, kind: input, shape index: {}]   ;;  %s285_s3 = inlined_call_operand.hbm [shape: bf16[16,32], index: 3, kind: output, shape index: {}]  }
   0x1   :  { %9 = vsyncpa [#allocation6], 0 }
   0x2   :  { %10 = vsyncpa [#allocation4], 0  ;;  %s15_s14 = sshll.u32 %s282_s0, 4  ;;  %s234_s15 = smov [#allocation2]   ;;  %s16_s14 = int_to_ptr.hbm [resolvable:$true] %s15_s14 }
   0x3   :  { %s17_s16 = sshll.u32 %s234_s15, 4  ;;  %s29_s19 = sshll.u32 %s283_s1, 4  ;;  %s18_s16 = int_to_ptr.vmem [resolvable:$true] %s17_s16  ;;  %s30_s19 = int_to_ptr.hbm [resolvable:$true] %s29_s19 }
   0x4   :  { %s235_s20 = smov 64   ;;  %s236_s21 = smov 4  }
   0x5   :  { %23 = dma.hbm_to_vmem [thread:$0]  %s16_s14, 128, %s18_s16, [#allocation3], %s235_s20, %s235_s20, %s236_s21  }
   0x6   :  { %s237_s22 = smov [#allocation5]  }
   0x7   :  { %s31_s23 = sshll.u32 %s237_s22, 4  ;;  %s32_s23 = int_to_ptr.vmem [resolvable:$true] %s31_s23 }
   0x8   :  { %34 = dma.hbm_to_vmem [thread:$0]  %s30_s19, 16, %s32_s23, [#allocation6]  }
   0x9   :  { %228 = dma.done.wait [#allocation3], 128  }
   0xa   :  { %229 = vsyncadd [#allocation3], 4294967168 }
   0xb   :  { %230 = dma.done.wait [#allocation6], 16  }
   0xc   :  { %231 = vsyncadd [#allocation6], 4294967280  ;;  %v139_v0 = vld [vmem:[#allocation2] sm:$0xff]   ;;  %vm49_vm0 = vcmask 261120   ;;  %v238_v5 = vmov 32.0   ;;  %vm115_vm7 = vcmask 257024  }
   0xd   :  { %v140_v1 = vunpack.c.l.bf16 %v139_v0  ;;  %v141_v3 = vunpack.c.h.bf16 %v139_v0  ;;  %150 = vrcp.f32 %v238_v5  ;;  %v148_v36 = vld [vmem:[#allocation5] ss:$0 sm:$0xff]  ;;  %v149_v40 = vld [vmem:[%s284_s2] ss:$0 sm:$0xff]  ;;  %s239_s24 = smov [#allocation7]   ;;  %s124_s2 = sshll.u32 %s285_s3, 4  ;;  %s125_s2 = int_to_ptr.hbm [resolvable:$true] %s124_s2 }
   0xe   :  { %s122_s25 = sshll.u32 %s239_s24, 4  ;;  %s123_s25 = int_to_ptr.vmem [resolvable:$true] %s122_s25 }
   0xf   :  { %v50_v2 = vsel %vm49_vm0, %v140_v1, 0.0  ;;  %v53_v4 = vsel %vm49_vm0, %v141_v3, 0.0 }
  0x10   :  { %51 = vadd.xlane.f32.xlu0 %v50_v2 }
  0x13   :  { %v151_v6 = vpop.eup %150 }
  0x14   :  { %v57_v7 = vmul.f32 32.0, %v151_v6  ;;  %vm61_vm1 = vweird.f32 %v151_v6 }
  0x16   :  { %v58_v8 = vsub.f32 1.0, %v57_v7 }
  0x18   :  { %54 = vadd.xlane.f32.xlu0 %v53_v4  ;;  %v59_v9 = vmul.f32 %v151_v6, %v58_v8 }
  0x1a   :  { %v60_v10 = vadd.f32 %v151_v6, %v59_v9 }
  0x1c   :  { %v62_v11 = vsel %vm61_vm1, %v151_v6, %v60_v10 }
  0x83   :  { %v52_v12 = vpop.xlane.xlu0 %51 }
  0x84   :  { %v63_v13 = vmul.f32 %v62_v11, %v52_v12 }
  0x86   :  { %v65_v14 = vsub.f32 %v140_v1, %v63_v13 }
  0x88   :  { %v67_v15 = vmul.f32 %v65_v14, %v65_v14 }
  0x8a   :  { %v69_v16 = vsel %vm49_vm0, %v67_v15, 0.0 }
  0x8b   :  { %70 = vadd.xlane.f32.xlu1 %v69_v16  ;;  %v55_v17 = vpop.xlane.xlu0 %54 }
  0x8c   :  { %v64_v18 = vmul.f32 %v62_v11, %v55_v17 }
  0x8e   :  { %v66_v19 = vsub.f32 %v141_v3, %v64_v18 }
  0x90   :  { %v68_v20 = vmul.f32 %v66_v19, %v66_v19 }
  0x92   :  { %v72_v21 = vsel %vm49_vm0, %v68_v20, 0.0 }
  0x93   :  { %73 = vadd.xlane.f32.xlu1 %v72_v21 }
  0xfe   :  { %v71_v22 = vpop.xlane.xlu1 %70 }
  0xff   :  { %v75_v23 = vmul.f32 %v71_v22, %v62_v11 }
 0x101   :  { %v77_v24 = vadd.f32 1e-12, %v75_v23 }
 0x103   :  { %152 = vrsqrt.f32 %v77_v24  ;;  %vm85_vm3 = vweird.f32 %v77_v24 }
 0x106   :  { %v74_v25 = vpop.xlane.xlu1 %73 }
 0x107   :  { %v76_v26 = vmul.f32 %v74_v25, %v62_v11 }
 0x109   :  { %v153_v27 = vpop.eup %152  ;;  %v78_v28 = vadd.f32 1e-12, %v76_v26 }
 0x10a   :  { %v80_v29 = vmul.f32 %v153_v27, %v77_v24  ;;  %vm86_vm2 = vweird.f32 %v153_v27 }
 0x10b   :  { %154 = vrsqrt.f32 %v78_v28  ;;  %vm87_vm4 = vmor %vm85_vm3, %vm86_vm2  ;;  %vm95_vm6 = vweird.f32 %v78_v28 }
 0x10c   :  { %v81_v30 = vmul.f32 %v153_v27, %v80_v29 }
 0x10e   :  { %v82_v31 = vmul.f32 0.5, %v81_v30 }
 0x110   :  { %v83_v32 = vsub.f32 1.5, %v82_v31 }
 0x111   :  { %v155_v33 = vpop.eup %154 }
 0x112   :  { %v84_v34 = vmul.f32 %v153_v27, %v83_v32  ;;  %v90_v35 = vmul.f32 %v155_v33, %v78_v28  ;;  %vm96_vm5 = vweird.f32 %v155_v33 }
 0x113   :  { %vm97_vm8 = vmor %vm95_vm6, %vm96_vm5 }
 0x114   :  { %v88_v37 = vsel %vm87_vm4, %v153_v27, %v84_v34  ;;  %v91_v38 = vmul.f32 %v155_v33, %v90_v35 }
 0x115   :  { %v99_v39 = vmul.f32 %v88_v37, %v65_v14 }
 0x116   :  { %v92_v41 = vmul.f32 0.5, %v91_v38 }
 0x117   :  { %v105_v42 = vmul.f32 %v148_v36, %v99_v39 }
 0x118   :  { %v93_v43 = vsub.f32 1.5, %v92_v41 }
 0x119   :  { %v111_v44 = vadd.f32 %v149_v40, %v105_v42 }
 0x11a   :  { %v94_v45 = vmul.f32 %v155_v33, %v93_v43 }
 0x11b   :  { %v113_v46 = vpack.c.bf16 %v111_v44, %v111_v44 }
 0x11c   :  { %v98_v47 = vsel %vm97_vm8, %v155_v33, %v94_v45 }
 0x11d   :  { %v100_v48 = vmul.f32 %v98_v47, %v66_v19  ;;  %116 = vst.msk [vmem:[#allocation7] sm:$0xf] %vm115_vm7, %v113_v46 }
 0x11f   :  { %v106_v49 = vmul.f32 %v148_v36, %v100_v48 }
 0x121   :  { %v112_v50 = vadd.f32 %v149_v40, %v106_v49 }
 0x123   :  { %v114_v51 = vpack.c.bf16 %v112_v50, %v112_v50 }
 0x125   :  { %117 = vst.msk [vmem:[#allocation7 + $0x4] sm:$0xf] %vm115_vm7, %v114_v51 }
 0x126   :  { %130 = dma.vmem_to_hbm [thread:$0]  %s123_s25, 128, %s125_s2, [#allocation4], %s235_s20, %s235_s20, %s236_s21  }
 0x127   :  { %232 = dma.done.wait [#allocation4], 128  }
 0x128   :  { %233 = vsyncadd [#allocation4], 4294967168 }
 0x129   :  { %135 = vsyncpa [#allocation3], 1 }
 0x12a   :  { %136 = vsyncpa [#allocation6], 1 }
 0x12b   :  { %137 = vsyncpa [#allocation4], 1 }

</bundles_post_ra>
